<compile_context>
chip_gen: v6e
topology: v6e:2x2x1
jax: 0.10.0
libtpu: 0.0.40
codegen_flags: <defaults>
</compile_context>

<pallas_src>
import jax
import jax.numpy as jnp
from jax import lax
from jax.experimental import pallas as pl
from jax.experimental.pallas import tpu as pltpu


def classification_kernel(x_ref, w1_ref, b1_ref, w2_ref, b2_ref, o_ref):
    # fc1 on the MXU: (TM, D) @ (D, H) -> (TM, H); bias add + ReLU on the VPU.
    h = jnp.dot(x_ref[...], w1_ref[...], preferred_element_type=jnp.float32)
    h = jnp.maximum(h + b1_ref[...], 0.0)

    # fc2 in the transposed orientation so the batch ends up on the lane axis:
    #   (8, H) contracted with (TM, H) on H  ->  (8, TM)     (q @ k^T pattern)
    # w2 is replicated across the 8 LHS rows in the wrapper, so row 0 is the
    # real fc2 output.  The MXU has enormous slack here; this replaces the old
    # 128-lane XLU reduce and keeps everything downstream lane-dense.
    yt = lax.dot_general(
        w2_ref[...], h, (((1,), (1,)), ((), ())),
        preferred_element_type=jnp.float32)             # (8, TM)
    y = yt[0:1, :] + b2_ref[0]                           # (1, TM); SMEM scalar bias

    # Sigmoid: exp and approximate reciprocal both ride the (otherwise idle)
    # EUP slot; no VPU divide.
    o_ref[...] = pl.reciprocal(1.0 + jnp.exp(-y), approx=True).astype(o_ref.dtype)


def classification_forward(x, w1, b1, w2, b2, *, tm=8192):
    """sigmoid(relu(x @ w1 + b1) @ w2 + b2) in float32.

    x: (B, 30); w1: (30, 10); b1: (10,); w2: (10, 1); b2: (1,).
    """
    B, D = x.shape
    H = w1.shape[1]

    # Batch tile: multiple of 128 so each tile's outputs fill whole 128-lane
    # rows (lane-dense epilogue and unmasked lane stores).  Clamp to the
    # rounded-up batch so tiny batches still compile.
    tm = max(128, min(tm, pl.cdiv(B, 128) * 128))
    tm = (tm // 128) * 128
    num_tiles = pl.cdiv(B, tm)   # ragged last tile handled by Pallas edge masking

    # VMEM accounting (per buffer, f32, lane/sublane padded in VMEM):
    #   x block   (tm, 30) -> padded (tm, 128) = 512*tm bytes  (2 MiB @ tm=4096)
    #   out block (1, tm)  -> padded (8, tm)   =  32*tm bytes
    # Both are double-buffered by the pipeline; weights/biases are a few KiB and
    # stay resident (constant index maps).
    x_buf_bytes = tm * 128 * 4
    out_buf_bytes = 8 * tm * 4
    vmem_limit = max(2 * (x_buf_bytes + out_buf_bytes) + (2 << 20), 16 << 20)

    b1_row = b1.reshape(1, H)                                   # (1, H) vreg bias add
    w2_rows = jnp.broadcast_to(w2.reshape(1, H), (8, H))        # (8, H) MXU LHS
    b2_smem = b2.reshape(1)                                     # scalar bias in SMEM

    cost = pl.CostEstimate(
        flops=2 * B * D * H + 2 * num_tiles * tm * 8 * H + 6 * num_tiles * tm,
        transcendentals=2 * num_tiles * tm,          # exp + reciprocal per row
        bytes_accessed=4 * (B * D + D * H + H + 8 * H + 1 + num_tiles * tm),
    )

    out = pl.pallas_call(
        classification_kernel,
        out_shape=jax.ShapeDtypeStruct((num_tiles, 1, tm), jnp.float32),
        grid_spec=pltpu.PrefetchScalarGridSpec(
            num_scalar_prefetch=0,
            grid=(num_tiles,),
            in_specs=[
                # x: streamed over the batch grid (double-buffered by Pallas).
                pl.BlockSpec((tm, D), lambda i: (i, 0)),
                # Weights / biases: constant block index -> resident in VMEM.
                pl.BlockSpec((D, H), lambda i: (0, 0)),
                pl.BlockSpec((1, H), lambda i: (0, 0)),
                pl.BlockSpec((8, H), lambda i: (0, 0)),
                # b2: scalar via SMEM (no padded VMEM tile, no vector-load slot).
                pl.BlockSpec(memory_space=pltpu.MemorySpace.SMEM),
            ],
            # Lane-dense output: one (1, tm) row per tile, contiguous writeback.
            out_specs=pl.BlockSpec((None, 1, tm), lambda i: (i, 0, 0)),
        ),
        compiler_params=pltpu.CompilerParams(
            # Batch tiles are independent -> shard across v7x's 2 TensorCores.
            dimension_semantics=("parallel",),
            vmem_limit_bytes=vmem_limit,
        ),
        cost_estimate=cost,
    )(x, w1, b1_row, w2_rows, b2_smem)

    # (num_tiles, 1, tm) -> (B, 1); garbage rows from the ragged tail are dropped.
    return out.reshape(-1)[:B].reshape(B, 1)


def init_params(key, in_features=30, hidden=10):
    # Deterministic init mimicking PyTorch nn.Linear default:
    # U(-1/sqrt(fan_in), 1/sqrt(fan_in)).  Stored pre-transposed: w1 (D, H), w2 (H, 1).
    k1, k2, k3, k4 = jax.random.split(key, 4)
    lim1 = 1.0 / jnp.sqrt(jnp.float32(in_features))
    lim2 = 1.0 / jnp.sqrt(jnp.float32(hidden))
    w1 = jax.random.uniform(k1, (in_features, hidden), jnp.float32, -lim1, lim1)
    b1 = jax.random.uniform(k2, (hidden,), jnp.float32, -lim1, lim1)
    w2 = jax.random.uniform(k3, (hidden, 1), jnp.float32, -lim2, lim2)
    b2 = jax.random.uniform(k4, (1,), jnp.float32, -lim2, lim2)
    return w1, b1, w2, b2


if __name__ == "__main__":
    key = jax.random.PRNGKey(0)
    kx, kp = jax.random.split(key)

    batch = 300        # deliberately NOT a tile multiple -> exercises the ragged tail
    in_features = 30   # matches nn.Linear(30, 10)
    hidden = 10

    x = jax.random.normal(kx, (batch, in_features), jnp.float32)
    w1, b1, w2, b2 = init_params(kp, in_features, hidden)

    # Small tile so the demo runs several pipelined grid steps; production
    # callers keep the default tm (8192+; up to 16k-32k on v7x).
    out = classification_forward(x, w1, b1, w2, b2, tm=128)
    out = jax.block_until_ready(out)

    # Pure-JAX reference check (tolerance covers the approx EUP reciprocal).
    ref = jax.nn.sigmoid(jnp.maximum(x @ w1 + b1, 0.0) @ w2 + b2)
    assert out.shape == (batch, 1)
    assert jnp.allclose(out, ref, atol=2e-3, rtol=2e-3), float(jnp.max(jnp.abs(out - ref)))

    print("KERNEL_OK")
</pallas_src>

<mosaic_0001>
module attributes {stable_mosaic.version = 11 : i64} {
  func.func @classification_kernel(%arg0: i32, %arg1: memref<128x30xf32, #tpu.memory_space<vmem>>, %arg2: memref<30x10xf32, #tpu.memory_space<vmem>>, %arg3: memref<1x10xf32, #tpu.memory_space<vmem>>, %arg4: memref<8x10xf32, #tpu.memory_space<vmem>>, %arg5: memref<1xf32, #tpu.memory_space<smem>>, %arg6: memref<1x1x128xf32, #tpu.memory_space<vmem>>) attributes {dimension_semantics = [#tpu.dimension_semantics<parallel>], iteration_bounds = array<i64: 3>, scalar_prefetch = 0 : i64, scratch_operands = 0 : i64, tpu.core_type = #tpu.core_type<tc>, window_params = [{transform_indices = @transform_0, window_bounds = array<i64: 128, 30>}, {pipeline_mode = #tpu.pipeline_mode<synchronous>, transform_indices = @transform_1, window_bounds = array<i64: 30, 10>}, {pipeline_mode = #tpu.pipeline_mode<synchronous>, transform_indices = @transform_2, window_bounds = array<i64: 1, 10>}, {pipeline_mode = #tpu.pipeline_mode<synchronous>, transform_indices = @transform_3, window_bounds = array<i64: 8, 10>}, {transform_indices = @transform_4, window_bounds = array<i64: 1>}, {transform_indices = @transform_5, window_bounds = array<i64: 1, 1, 128>}]} {
    %c0 = arith.constant 0 : index
    %c0_0 = arith.constant 0 : index
    %0 = vector.load %arg1[%c0, %c0_0] : memref<128x30xf32, #tpu.memory_space<vmem>>, vector<128x30xf32>
    %c0_1 = arith.constant 0 : index
    %c0_2 = arith.constant 0 : index
    %1 = vector.load %arg2[%c0_1, %c0_2] : memref<30x10xf32, #tpu.memory_space<vmem>>, vector<30x10xf32>
    %cst = arith.constant dense<0.000000e+00> : vector<128x10xf32>
    %2 = tpu.matmul %0, %1, %cst {dimension_numbers = #tpu.dot_dimension_numbers<[1], [0], [0], [1], [0, 0, 1, 1], [], []>} : vector<128x30xf32>, vector<30x10xf32>, vector<128x10xf32> -> vector<128x10xf32>
    %c0_3 = arith.constant 0 : index
    %c0_4 = arith.constant 0 : index
    %3 = vector.load %arg3[%c0_3, %c0_4] : memref<1x10xf32, #tpu.memory_space<vmem>>, vector<1x10xf32>
    %4 = vector.broadcast %3 : vector<1x10xf32> to vector<128x10xf32>
    %5 = arith.addf %2, %4 : vector<128x10xf32>
    %cst_5 = arith.constant 0.000000e+00 : f32
    %6 = vector.broadcast %cst_5 : f32 to vector<128x10xf32>
    %7 = arith.maximumf %5, %6 : vector<128x10xf32>
    %c0_6 = arith.constant 0 : index
    %c0_7 = arith.constant 0 : index
    %8 = vector.load %arg4[%c0_6, %c0_7] : memref<8x10xf32, #tpu.memory_space<vmem>>, vector<8x10xf32>
    %cst_8 = arith.constant dense<0.000000e+00> : vector<8x128xf32>
    %9 = tpu.matmul %8, %7, %cst_8 {dimension_numbers = #tpu.dot_dimension_numbers<[1], [1], [0], [0], [0, 0, 1, 0], [], []>} : vector<8x10xf32>, vector<128x10xf32>, vector<8x128xf32> -> vector<8x128xf32>
    %10 = vector.extract_strided_slice %9 {offsets = [0, 0], sizes = [1, 128], strides = [1, 1]} : vector<8x128xf32> to vector<1x128xf32>
    %c0_9 = arith.constant 0 : index
    %11 = memref.load %arg5[%c0_9] : memref<1xf32, #tpu.memory_space<smem>>
    %12 = vector.broadcast %11 : f32 to vector<1x128xf32>
    %13 = arith.addf %10, %12 : vector<1x128xf32>
    %cst_10 = arith.constant 0.000000e+00 : f32
    %14 = vector.broadcast %cst_10 : f32 to vector<1x128xf32>
    %15 = arith.subf %14, %13 : vector<1x128xf32>
    %16 = math.exp %15 : vector<1x128xf32>
    %cst_11 = arith.constant 1.000000e+00 : f32
    %17 = vector.broadcast %cst_11 : f32 to vector<1x128xf32>
    %18 = arith.addf %17, %16 : vector<1x128xf32>
    %19 = tpu.reciprocal %18 {approx = true} : vector<1x128xf32> -> vector<1x128xf32>
    %c0_12 = arith.constant 0 : index
    %c0_13 = arith.constant 0 : index
    %c0_14 = arith.constant 0 : index
    %20 = vector.load %arg6[%c0_12, %c0_13, %c0_14] : memref<1x1x128xf32, #tpu.memory_space<vmem>>, vector<1x1x128xf32>
    %21 = vector.shape_cast %20 : vector<1x1x128xf32> to vector<1x128xf32>
    %22 = vector.shape_cast %19 : vector<1x128xf32> to vector<1x1x128xf32>
    tpu.vector_store %arg6[%c0_12, %c0_13, %c0_14], %22 {strides = array<i32>} : memref<1x1x128xf32, #tpu.memory_space<vmem>>, vector<1x1x128xf32>,
    return
  }
  func.func @transform_0(%arg0: i32) -> (i32, i32) {
    %c0_i32 = arith.constant 0 : i32
    %c0_i32_0 = arith.constant 0 : i32
    return %arg0, %c0_i32 : i32, i32
  }
  func.func @transform_1(%arg0: i32) -> (i32, i32) {
    %c0_i32 = arith.constant 0 : i32
    %c0_i32_0 = arith.constant 0 : i32
    %c0_i32_1 = arith.constant 0 : i32
    return %c0_i32, %c0_i32_0 : i32, i32
  }
  func.func @transform_2(%arg0: i32) -> (i32, i32) {
    %c0_i32 = arith.constant 0 : i32
    %c0_i32_0 = arith.constant 0 : i32
    %c0_i32_1 = arith.constant 0 : i32
    return %c0_i32, %c0_i32_0 : i32, i32
  }
  func.func @transform_3(%arg0: i32) -> (i32, i32) {
    %c0_i32 = arith.constant 0 : i32
    %c0_i32_0 = arith.constant 0 : i32
    %c0_i32_1 = arith.constant 0 : i32
    return %c0_i32, %c0_i32_0 : i32, i32
  }
  func.func @transform_4(%arg0: i32) -> i32 {
    %c0_i32 = arith.constant 0 : i32
    %c0_i32_0 = arith.constant 0 : i32
    return %c0_i32 : i32
  }
  func.func @transform_5(%arg0: i32) -> (i32, i32, i32) {
    %c0_i32 = arith.constant 0 : i32
    %c0_i32_0 = arith.constant 0 : i32
    %c0_i32_1 = arith.constant 0 : i32
    return %arg0, %c0_i32, %c0_i32_0 : i32, i32, i32
  }
}

</mosaic_0001>

<bundles_post_ra>
// kernel: tpu_custom_call.1
= control target key start
LH: loop header
LB: loop body
LE: loop exit
PB: predicated region body
PF: predicated region fallthrough
CT: control target
= control target key end

     0   :  { %s1164_s0 = inlined_call_operand.vmem [shape: f32[300,30], index: 0, kind: input, shape index: {}]   ;;  %s1165_s1 = inlined_call_operand.vmem [shape: f32[30,10], index: 1, kind: input, shape index: {}]   ;;  %s1166_s2 = inlined_call_operand.vmem [shape: f32[1,10], index: 2, kind: input, shape index: {}]   ;;  %s1167_s3 = inlined_call_operand.vmem [shape: f32[8,10], index: 3, kind: input, shape index: {}]   ;;  %s1168_s4 = inlined_call_operand.<no memory space> [shape: f32[1], index: 4, kind: input, shape index: {}]   ;;  %s1169_s5 = inlined_call_operand.hbm [shape: f32[3,1,128], index: 5, kind: output, shape index: {}]  }
   0x1   :  { %10 = sst [smem:[#allocation2]] %s1168_s4 }
   0x2   :  { %11 = vsyncpa [#allocation4], 0 }
   0x3   :  { %13 = vsyncpa [#allocation4 + $0x1], 0  ;;  %s977_s20 = smov 0   ;;  %s979_s21 = smov 0  }
   0x4   :  { %s981_s22 = smov 0   ;;  %s983_s23 = smov 0  }
   0x5 LB: > { %s685_s4 = sadd.s32 4294967295, %s939_s23   ;;  %s686_s24 = sadd.s32 4294967294, %s939_s23   ;;  %s939_s23 = sphi %s983_s23, %s1175_s23   ;;  %s935_s22 = sphi %s981_s22, %s1174_s22   ;;  %s931_s21 = sphi %s979_s21, %s1173_s21   ;;  %s927_s20 = sphi %s977_s20, %s1172_s20  }
   0x6   : > { %s1000_s25 = sadd.s32 1, %s939_s23   ;;  %s136_s26 = sadd.s32 1, %s935_s22 }
   0x7   : > { %s133_s27 = ssub.s32 %s939_s23, %s1000_s25  ;;  %p146_p0 = scmp.ne.s32.totalorder %s935_s22, %s931_s21 }
   0x8   : > { %p134_p1 = scmp.eq.s32.totalorder %s133_s27, 0  ;;  %p147_p2 = scmp.eq.s32.totalorder %s685_s4, 2 }
   0x9   : > { %p152_p3 = scmp.ne.s32.totalorder %s931_s21, %s927_s20  ;;  %p153_p4 = scmp.eq.s32.totalorder %s686_s24, 2 }
   0xa   : > { %s1010_s28 = scalar_select %p134_p1, %s935_s22, %s136_s26  }
   0xb   : > { %p1012_p5 = por %p147_p2, %p146_p0  ;;  %p1016_p6 = por %p153_p4, %p152_p3 }
   0xc   : > { %p689_p7 = scmp.ge.s32.totalorder %s939_s23, 1  ;;  %p200_p8 = scmp.lt.s32.totalorder %s939_s23, 4 }
   0xe   : > { %p201_p9 = pnand %p689_p7, %p200_p8 }
   0xf   : > { %s1028_s10 = sshll.u32 (!%p201_p9), %s685_s4, 4  ;;  %s609_s6 = sld [smem:[#allocation2]] (!%p201_p9) }
  0x10   : > { %204 = sbr.rel (%p201_p9) target bundleno = 560 (0x230), region = 40  ;;  %p236_p10 = scmp.lt.s32.totalorder (!%p201_p9), %s1028_s10, 37 }
  0x11   : > { %s229_s7 = sand.u32 (!%p201_p9), 1, %s931_s21  }
  0x12   : > { %s230_s8 = scalar_lea.vmem (!%p201_p9), [#allocation3], %s229_s7  ;;  %s619_s14 = scalar_lea.sflag (!%p201_p9), [#allocation4], %s229_s7 }
  0x13   : > { %s631_s9 = sshll.u32 (!%p201_p9), %s230_s8, 4  ;;  %s632_s9 = int_to_ptr.vmem [resolvable:$true] %s631_s9 }
  0x14   : > { %s879_s15 = scalar_lea.vmem (!%p201_p9), %s632_s9, 16 }
  0x15   : > { %v264_v0 = vld [vmem:[%s1165_s1 + $0x18] sm:$0x3f]  ;;  %vm321_vm0 = vcmask 1045504   ;;  %v263_v1 = vld [vmem:[%s1165_s1 + $0x10] sm:$0xff]  ;;  %v262_v2 = vld [vmem:[%s1165_s1 + $0x8] sm:$0xff]  ;;  %s237_s13 = scalar_select %p236_p10, %s1028_s10, 37 }
  0x16   : > { %767 = vmatprep.subr.msk.mxu0 %vm321_vm0, %v264_v0  ;;  %v261_v3 = vld [vmem:[%s1165_s1] sm:$0xff]  ;;  %vm272_vm1 = vcmask 244736   ;;  %v941_v20 = vmov 0.0   ;;  %vm942_vm2 = vmmov 0   ;;  %vm487_vm3 = vcmask 80896   ;;  %p880_p11 = scmp.ne.s32.totalorder %s632_s9, %s879_s15 }
  0x17   : > { %768 = vmatpush3.msk.msra.mxu0 %vm321_vm0, %v264_v0  ;;  %s691_s16 = sshll.u32 %s237_s13, 3  ;;  %799 = vmatprep.subr.mxu1 %v941_v20  ;;  %v692_v35 = vld [vmem:[%s1166_s2] ss:$0 sm:$0xff]  ;;  %s1129_s13 = scalar_lea.hbm %s1169_s5, %s1028_s10 }
  0x18   : > { %769 = vmatprep.subr.mxu0 %v263_v1  ;;  %s1041_s19 = scalar_lea.vmem %s1164_s0, %s691_s16  ;;  %831 = vmatprep.mubr.msk.f32.mxu1 %vm942_vm2, %v941_v20  ;;  %p881_p12 = pnand %p880_p11, %p1012_p5 }
  0x19   : > { %770 = vmatpush3.msra.mxu0 %v263_v1  ;;  %v245_v4 = vld [vmem:[%s1041_s19] sm:$0xff]  ;;  %v246_v5 = vld [vmem:[%s1041_s19 + $0x8] sm:$0xff]  ;;  %v247_v6 = vld [vmem:[%s1041_s19 + $0x10] sm:$0xff]  ;;  %s943_s16 = smov [#allocation3]  }
  0x1a   : > { %771 = vmatprep.subr.mxu0 %v262_v2  ;;  %775 = vmatprep.mubr.msk.f32.mxu0 %vm272_vm1, %v245_v4  ;;  %v248_v7 = vld [vmem:[%s1041_s19 + $0x18] sm:$0xff]  ;;  %v249_v8 = vld [vmem:[%s1041_s19 + $0x20] sm:$0xff]  ;;  %v250_v9 = vld [vmem:[%s1041_s19 + $0x28] sm:$0xff]  ;;  %p882_p13 = pneg %p881_p12  ;;  %s883_s17 = sshll.u32 %s943_s16, 4  ;;  %s884_s17 = int_to_ptr.vmem [resolvable:$false] %s883_s17 }
  0x1b   : > { %772 = vmatpush3.msra.mxu0 %v262_v2  ;;  %v251_v10 = vld [vmem:[%s1041_s19 + $0x30] sm:$0xff]  ;;  %v252_v11 = vld [vmem:[%s1041_s19 + $0x38] sm:$0xff]  ;;  %v253_v12 = vld [vmem:[%s1041_s19 + $0x40] sm:$0xff]  ;;  %s885_s18 = scalar_lea.vmem %s884_s17, 32  ;;  %p886_p0 = scmp.lt.s32.totalorder %s632_s9, %s884_s17 }
  0x1c   : > { %773 = vmatprep.subr.mxu0 %v261_v3  ;;  %v254_v13 = vld [vmem:[%s1041_s19 + $0x48] sm:$0xff]  ;;  %v255_v14 = vld [vmem:[%s1041_s19 + $0x50] sm:$0xff]  ;;  %v256_v15 = vld [vmem:[%s1041_s19 + $0x58] sm:$0xff]  ;;  %p887_p1 = scmp.lt.s32.totalorder %s885_s18, %s879_s15 }
  0x1d   : > { %774 = vmatpush3.msra.mxu0 %v261_v3  ;;  %v257_v16 = vld [vmem:[%s1041_s19 + $0x60] sm:$0xff]  ;;  %v258_v17 = vld [vmem:[%s1041_s19 + $0x68] sm:$0xff]  ;;  %v259_v18 = vld [vmem:[%s1041_s19 + $0x70] sm:$0xff] }
  0x1e   : > { %776 = vmatmul.mubr.msk.f32.vlgmr.msra.gmra.mxu0 %vm272_vm1, %v246_v5  ;;  %v260_v19 = vld [vmem:[%s1041_s19 + $0x78] sm:$0xff]  ;;  %p888_p2 = por %p887_p1, %p886_p0 }
  0x1f   : > { %778 = vmatprep.mubr.msk.f32.mxu0 %vm272_vm1, %v247_v6  ;;  %v486_v6 = vld [vmem:[%s1167_s3] sm:$0xff] }
  0x20   : > { %p889_p3 = pnand %p888_p2, %p882_p13 }
  0x22   : > { %779 = vmatmul.mubr.msk.f32.gmra.mxu0 %vm272_vm1, %v248_v7  ;;  %v610_v7 = vstv %s609_s6 }
  0x23   : > { %781 = vmatprep.mubr.msk.f32.mxu0 %vm272_vm1, %v249_v8 }
  0x26   : > { %782 = vmatmul.mubr.msk.f32.gmra.mxu0 %vm272_vm1, %v250_v9 }
  0x27   : > { %784 = vmatprep.mubr.msk.f32.mxu0 %vm272_vm1, %v251_v10 }
  0x2a   : > { %785 = vmatmul.mubr.msk.f32.gmra.mxu0 %vm272_vm1, %v252_v11 }
  0x2b   : > { %787 = vmatprep.mubr.msk.f32.mxu0 %vm272_vm1, %v253_v12 }
  0x2e   : > { %788 = vmatmul.mubr.msk.f32.gmra.mxu0 %vm272_vm1, %v254_v13 }
  0x2f   : > { %790 = vmatprep.mubr.msk.f32.mxu0 %vm272_vm1, %v255_v14 }
  0x32   : > { %791 = vmatmul.mubr.msk.f32.gmra.mxu0 %vm272_vm1, %v256_v15 }
  0x33   : > { %793 = vmatprep.mubr.msk.f32.mxu0 %vm272_vm1, %v257_v16 }
  0x36   : > { %794 = vmatmul.mubr.msk.f32.gmra.mxu0 %vm272_vm1, %v258_v17 }
  0x37   : > { %796 = vmatprep.mubr.msk.f32.mxu0 %vm272_vm1, %v259_v18 }
  0x3a   : > { %797 = vmatmul.mubr.msk.f32.gmra.mxu0 %vm272_vm1, %v260_v19 }
  0xde   : > { %v1077_v21 = vpop.f32.mrf.mxu0 }
  0xdf   : > { %v397_v1 = vadd.f32 %v1077_v21, %v692_v35 }
  0xe0   : > { %v1079_v22 = vpop.f32.mrf.mxu0 }
  0xe1   : > { %v471_v3 = vmax.f32 %v397_v1, 0.0  ;;  %v392_v4 = vadd.f32 %v692_v35, %v1079_v22 }
  0xe2   : > { %v780_v23 = vpop.f32.mrf.mxu0 }
  0xe3   : > { %v407_v61 = vadd.f32 %v780_v23, %v692_v35  ;;  %v470_v5 = vmax.f32 %v392_v4, 0.0 }
  0xe4   : > { %v1081_v24 = vpop.f32.mrf.mxu0 }
  0xe5   : > { %v473_v63 = vmax.f32 %v407_v61, 0.0  ;;  %v402_v0 = vadd.f32 %v692_v35, %v1081_v24 }
  0xe6   : > { %v783_v25 = vpop.f32.mrf.mxu0 }
  0xe7   : > { %v417_v57 = vadd.f32 %v783_v25, %v692_v35  ;;  %v472_v2 = vmax.f32 %v402_v0, 0.0 }
  0xe8   : > { %v411_v26 = vpop.f32.mrf.mxu0 }
  0xe9   : > { %v475_v59 = vmax.f32 %v417_v57, 0.0  ;;  %v412_v60 = vadd.f32 %v692_v35, %v411_v26 }
  0xea   : > { %v786_v27 = vpop.f32.mrf.mxu0 }
  0xeb   : > { %v427_v53 = vadd.f32 %v786_v27, %v692_v35  ;;  %v474_v62 = vmax.f32 %v412_v60, 0.0 }
  0xec   : > { %v421_v28 = vpop.f32.mrf.mxu0 }
  0xed   : > { %v477_v55 = vmax.f32 %v427_v53, 0.0  ;;  %v422_v56 = vadd.f32 %v692_v35, %v421_v28 }
  0xee   : > { %v789_v29 = vpop.f32.mrf.mxu0 }
  0xef   : > { %v437_v49 = vadd.f32 %v789_v29, %v692_v35  ;;  %v476_v58 = vmax.f32 %v422_v56, 0.0 }
  0xf0   : > { %v431_v30 = vpop.f32.mrf.mxu0 }
  0xf1   : > { %v479_v51 = vmax.f32 %v437_v49, 0.0  ;;  %v432_v52 = vadd.f32 %v692_v35, %v431_v30 }
  0xf2   : > { %v792_v31 = vpop.f32.mrf.mxu0 }
  0xf3   : > { %v447_v45 = vadd.f32 %v792_v31, %v692_v35  ;;  %v478_v54 = vmax.f32 %v432_v52, 0.0 }
  0xf4   : > { %v441_v32 = vpop.f32.mrf.mxu0 }
  0xf5   : > { %v481_v47 = vmax.f32 %v447_v45, 0.0  ;;  %v442_v48 = vadd.f32 %v692_v35, %v441_v32 }
  0xf6   : > { %v795_v33 = vpop.f32.mrf.mxu0 }
  0xf7   : > { %v457_v41 = vadd.f32 %v795_v33, %v692_v35  ;;  %v480_v50 = vmax.f32 %v442_v48, 0.0 }
  0xf8   : > { %v451_v34 = vpop.f32.mrf.mxu0 }
  0xf9   : > { %v483_v43 = vmax.f32 %v457_v41, 0.0  ;;  %v452_v44 = vadd.f32 %v692_v35, %v451_v34 }
  0xfa   : > { %v798_v36 = vpop.f32.mrf.mxu0 }
  0xfb   : > { %v467_v37 = vadd.f32 %v798_v36, %v692_v35  ;;  %v482_v46 = vmax.f32 %v452_v44, 0.0 }
  0xfc   : > { %v461_v38 = vpop.f32.mrf.mxu0 }
  0xfd   : > { %v485_v39 = vmax.f32 %v467_v37, 0.0  ;;  %v462_v40 = vadd.f32 %v692_v35, %v461_v38 }
  0xff   : > { %800 = vmatpush3.xpose.msk.msra.mxu1 %vm487_vm3, %v485_v39  ;;  %v484_v42 = vmax.f32 %v462_v40, 0.0 }
 0x100   : > { %801 = vmatprep.subr.mxu1 %v941_v20 }
 0x103   : > { %802 = vmatpush3.xpose.msk.msra.mxu1 %vm487_vm3, %v484_v42 }
 0x104   : > { %803 = vmatprep.subr.mxu1 %v941_v20 }
 0x107   : > { %804 = vmatpush3.xpose.msk.msra.mxu1 %vm487_vm3, %v483_v43 }
 0x108   : > { %805 = vmatprep.subr.mxu1 %v941_v20 }
 0x10b   : > { %806 = vmatpush3.xpose.msk.msra.mxu1 %vm487_vm3, %v482_v46 }
 0x10c   : > { %807 = vmatprep.subr.mxu1 %v941_v20 }
 0x10f   : > { %808 = vmatpush3.xpose.msk.msra.mxu1 %vm487_vm3, %v481_v47 }
 0x110   : > { %809 = vmatprep.subr.mxu1 %v941_v20 }
 0x113   : > { %810 = vmatpush3.xpose.msk.msra.mxu1 %vm487_vm3, %v480_v50 }
 0x114   : > { %811 = vmatprep.subr.mxu1 %v941_v20 }
 0x117   : > { %812 = vmatpush3.xpose.msk.msra.mxu1 %vm487_vm3, %v479_v51 }
 0x118   : > { %813 = vmatprep.subr.mxu1 %v941_v20 }
 0x11b   : > { %814 = vmatpush3.xpose.msk.msra.mxu1 %vm487_vm3, %v478_v54 }
 0x11c   : > { %815 = vmatprep.subr.mxu1 %v941_v20 }
 0x11f   : > { %816 = vmatpush3.xpose.msk.msra.mxu1 %vm487_vm3, %v477_v55 }
 0x120   : > { %817 = vmatprep.subr.mxu1 %v941_v20 }
 0x123   : > { %818 = vmatpush3.xpose.msk.msra.mxu1 %vm487_vm3, %v476_v58 }
 0x124   : > { %819 = vmatprep.subr.mxu1 %v941_v20 }
 0x127   : > { %820 = vmatpush3.xpose.msk.msra.mxu1 %vm487_vm3, %v475_v59 }
 0x128   : > { %821 = vmatprep.subr.mxu1 %v941_v20 }
 0x12b   : > { %822 = vmatpush3.xpose.msk.msra.mxu1 %vm487_vm3, %v474_v62 }
 0x12c   : > { %823 = vmatprep.subr.mxu1 %v941_v20 }
 0x12f   : > { %824 = vmatpush3.xpose.msk.msra.mxu1 %vm487_vm3, %v473_v63 }
 0x130   : > { %825 = vmatprep.subr.mxu1 %v941_v20 }
 0x133   : > { %826 = vmatpush3.xpose.msk.msra.mxu1 %vm487_vm3, %v472_v2 }
 0x134   : > { %827 = vmatprep.subr.mxu1 %v941_v20 }
 0x137   : > { %828 = vmatpush3.xpose.msk.msra.mxu1 %vm487_vm3, %v471_v3 }
 0x138   : > { %829 = vmatprep.subr.mxu1 %v941_v20 }
 0x13b   : > { %830 = vmatpush3.xpose.msk.msra.mxu1 %vm487_vm3, %v470_v5 }
 0x13e   : > { %832 = vmatmul.mubr.msk.f32.vlgmr.msra.gmra.mxu1 %vm487_vm3, %v486_v6 }
 0x1fe   : > { %v605_v8 = vpop.f32.mrf.mxu1 }
 0x1ff   : > { %v611_v9 = vadd.f32 %v610_v7, %v605_v8 }
 0x200   : > { %v833_v10 = vpop.f32.mrf.mxu1 }
 0x201   : > { %v612_v11 = vsub.f32 0.0, %v611_v9 }
 0x203   : > { %v613_v12 = vmul.f32 1.442695, %v612_v11 }
 0x205   : > { %875 = vpow2.f32 %v613_v12 }
 0x212   : > { %v876_v13 = vpop.eup %875 }
 0x213   : > { %v615_v14 = vadd.f32 1.0, %v876_v13 }
 0x215   : > { %877 = vrcp.f32 %v615_v14 }
 0x222   : > { %v878_v15 = vpop.eup %877 }
 0x223   : > { %617 = vst [vmem:[%s230_s8] sm:$0x1] %v878_v15 }
 0x224   : > { %892 = shalt.err (!%p889_p3)
}
 0x225   : > { %s893_s10 = scalar_lea.hbm %s1129_s13, 16  ;;  %s897_s24 = scalar_lea.hbm %s1169_s5, 48 }
 0x226   : > { %p894_p4 = scmp.ne.s32.totalorder %s1129_s13, %s893_s10  ;;  %p898_p9 = scmp.lt.s32.totalorder %s1129_s13, %s1169_s5 }
 0x227   : > { %p899_p10 = scmp.lt.s32.totalorder %s897_s24, %s893_s10 }
 0x228   : > { %p895_p7 = pnand %p894_p4, %p1012_p5 }
 0x229   : > { %p900_p11 = por %p899_p10, %p898_p9 }
 0x22a   : > { %p896_p8 = pneg %p895_p7 }
 0x22c   : > { %p901_p12 = pnand %p900_p11, %p896_p8 }
 0x22e   : > { %904 = shalt.err (!%p901_p12)
}
 0x22f   : > { %834 = dma.vmem_to_hbm [thread:$0]  (%p1012_p5), %s632_s9, 16, %s1129_s13, %s619_s14  }
 0x230 PF: > { %p840_p13 = scmp.ge.s32.totalorder %s939_s23, 2  ;;  %s643_s6 = sand.u32 1, %s927_s20  }
 0x231   : > { %s644_s7 = scalar_lea.sflag [#allocation4], %s643_s6 }
 0x232   : > { %p837_p0 = pnand %p840_p13, %p1016_p6 }
 0x234   : > { %p838_p1 = pneg %p837_p0 }
 0x236   : > { %922 = dma.done.wait (%p838_p1), %s644_s7, 16  }
 0x237   : > { %924 = vsyncadd (%p838_p1), %s644_s7, 4294967280  ;;  %p16_p2 = scmp.ge.s32.totalorder %s1000_s25, 5   ;;  %s1172_s20 = smov %s931_s21 }
 0x238   : > { %s1173_s21 = smov %s935_s22  ;;  %s1174_s22 = smov %s1010_s28 }
 0x239   : > { %s1175_s23 = smov %s1000_s25  ;;  %18 = sbr.rel (!%p16_p2) target bundleno = 5 (0x5), region = 75 }
 0x23e   :  { %648 = vsyncpa [#allocation4], 1 }
 0x23f   :  { %650 = vsyncpa [#allocation4 + $0x1], 1 }

</bundles_post_ra>
